<compile_context>
chip_gen: v7x
topology: tpu7x:2x2x1
jax: 0.10.0
libtpu: 0.0.40
codegen_flags: <defaults>
</compile_context>

<pallas_src>
import jax
import jax.numpy as jnp
from jax.experimental import pallas as pl
from jax.experimental.pallas import tpu as pltpu


def _descriptor_linear_kernel(x_ref, w_ref, shift_ref, o_ref):
    # MXU matmul (bf16 operands, f32 accumulation) + fused affine shift +
    # leaky_relu as a single VPU max.
    y = jnp.dot(x_ref[...], w_ref[...], preferred_element_type=jnp.float32)
    y = y + shift_ref[...]
    o_ref[...] = jnp.maximum(y, 0.01 * y)  # F.leaky_relu, default slope 0.01


def prepare_descriptor_linear_params(weight, bias, bn_gamma, bn_beta, bn_mean,
                                     bn_var, eps=1e-5, batch_normalize=True):
    """One-time (out-of-hot-path) folding of Linear bias + eval-mode BatchNorm.

    weight: [D_out, D_in] (PyTorch layout), bias/bn_*: [D_out].
    Returns (W' [D_in, D_out] bf16, shift' [1, D_out] f32).
    """
    D_out, _ = weight.shape
    if batch_normalize:
        scale = bn_gamma / jnp.sqrt(bn_var + eps)          # [D_out]
        shift = bn_beta + (bias - bn_mean) * scale         # [D_out]
    else:
        scale = jnp.ones((D_out,), jnp.float32)
        shift = bias.astype(jnp.float32)

    w_folded = weight.T.astype(jnp.float32) * scale[None, :]     # [D_in, D_out]
    w_bf16 = w_folded.astype(jnp.bfloat16)                       # one-time cast
    shift_f32 = shift.astype(jnp.float32).reshape(1, D_out)
    return w_bf16, shift_f32


def descriptor_linear(x, w_bf16, shift, *, batch_tile=2048):
    """Hot path.  x: [B, D_in] (bf16 preferred).  -> [B, D_out] f32."""
    B, D_in = x.shape
    d_out = w_bf16.shape[1]

    if x.dtype != jnp.bfloat16:
        # Prefer casting once upstream (data-prep); this is a fallback only.
        x = x.astype(jnp.bfloat16)

    if B <= batch_tile:
        # Small batch: single invocation, whole arrays resident in VMEM, no
        # grid / pipelining machinery.
        return pl.pallas_call(
            _descriptor_linear_kernel,
            out_shape=jax.ShapeDtypeStruct((B, d_out), jnp.float32),
            in_specs=[
                pl.BlockSpec(memory_space=pltpu.MemorySpace.VMEM),
                pl.BlockSpec(memory_space=pltpu.MemorySpace.VMEM),
                pl.BlockSpec(memory_space=pltpu.MemorySpace.VMEM),
            ],
            out_specs=pl.BlockSpec(memory_space=pltpu.MemorySpace.VMEM),
        )(x, w_bf16, shift)

    # Large batch: tile over B.  Pick an even number of grid steps (balanced
    # split across v7x's two TensorCores) with an 8-aligned (sublane) tile.
    n_steps = pl.cdiv(B, batch_tile)
    if n_steps % 2:
        n_steps += 1
    tile = ((pl.cdiv(B, n_steps) + 7) // 8) * 8
    grid = (pl.cdiv(B, tile),)

    # Scoped-VMEM estimate: triple-buffered x stream, double-buffered output,
    # resident W'/shift'.  Explicit limit mainly for v5e's 16 MiB default.
    est_vmem = (3 * tile * D_in * 2          # x (bf16), Buffered(3)
                + 2 * tile * d_out * 4       # out (f32), double-buffered
                + 2 * (D_in * d_out * 2 + d_out * 4))
    vmem_limit = max(32 << 20, min(est_vmem + (4 << 20), 96 << 20))

    cost = pl.CostEstimate(
        flops=2 * B * D_in * d_out,
        transcendentals=0,
        bytes_accessed=B * D_in * 2 + D_in * d_out * 2 + d_out * 4
                       + B * d_out * 4)

    return pl.pallas_call(
        _descriptor_linear_kernel,
        out_shape=jax.ShapeDtypeStruct((B, d_out), jnp.float32),
        grid=grid,
        in_specs=[
            # Streamed x tiles; 3-deep buffering to hide DMA issue jitter
            # (matters most at v7x's 3.2 TB/s; harmless on v5e/v6e).
            pl.BlockSpec((tile, D_in), lambda i: (i, 0),
                         pipeline_mode=pl.Buffered(3)),
            # W'/shift' stay resident across the grid (constant block index).
            pl.BlockSpec((D_in, d_out), lambda i: (0, 0)),
            pl.BlockSpec((1, d_out), lambda i: (0, 0)),
        ],
        # Unpadded, directly-consumable output: last dim 32 == full output dim.
        out_specs=pl.BlockSpec((tile, d_out), lambda i: (i, 0)),
        compiler_params=pltpu.CompilerParams(
            dimension_semantics=("parallel",),
            vmem_limit_bytes=vmem_limit),
        cost_estimate=cost,
    )(x, w_bf16, shift)


def _reference_f32(x, weight, bias, bn_gamma, bn_beta, bn_mean, bn_var,
                   eps=1e-5, batch_normalize=True):
    """Full-precision reference of the PyTorch eval-mode forward."""
    y = x @ weight.T + bias
    if batch_normalize:
        y = (y - bn_mean) / jnp.sqrt(bn_var + eps) * bn_gamma + bn_beta
    return jnp.where(y > 0, y, 0.01 * y)


def _reference_matched(x_bf16, w_bf16, shift):
    """Reference that follows the kernel's exact numerics (bf16 in, f32 acc)."""
    y = jnp.dot(x_bf16, w_bf16, preferred_element_type=jnp.float32) + shift
    return jnp.maximum(y, 0.01 * y)


if __name__ == "__main__":
    D_IN = 200    # stand-in for len(Descriptors._descList)
    D_OUT = 32    # out_lin
    B = 8

    key = jax.random.PRNGKey(0)
    kx, kw, kb, kx2 = jax.random.split(key, 4)

    x = jax.random.normal(kx, (B, D_IN), dtype=jnp.float32)

    # Deterministic parameter init (PyTorch Linear-style uniform bound).
    bound = 1.0 / (D_IN ** 0.5)
    weight = jax.random.uniform(kw, (D_OUT, D_IN), jnp.float32, -bound, bound)
    bias = jax.random.uniform(kb, (D_OUT,), jnp.float32, -bound, bound)

    # BatchNorm1d running stats / affine (eval mode), perturbed so the folding
    # is actually exercised.
    bn_gamma = jnp.ones((D_OUT,), jnp.float32) * 1.1
    bn_beta = jnp.full((D_OUT,), 0.05, jnp.float32)
    bn_mean = jnp.full((D_OUT,), 0.02, jnp.float32)
    bn_var = jnp.ones((D_OUT,), jnp.float32) * 0.9

    # One-time parameter folding + bf16 cast (outside the hot path).
    w_bf16, shift = prepare_descriptor_linear_params(
        weight, bias, bn_gamma, bn_beta, bn_mean, bn_var, batch_normalize=True)

    # One-time data-prep cast of the activations.
    x_bf16 = x.astype(jnp.bfloat16)

    # --- Small-batch (no-grid) path ---------------------------------------
    out = descriptor_linear(x_bf16, w_bf16, shift)
    jax.block_until_ready(out)
    assert out.shape == (B, D_OUT)

    ref_match = _reference_matched(x_bf16, w_bf16, shift)
    assert jnp.allclose(out, ref_match, atol=1e-4, rtol=1e-4), \
        "small-batch mismatch vs matched (bf16) reference"

    ref_full = _reference_f32(x, weight, bias, bn_gamma, bn_beta, bn_mean, bn_var)
    assert jnp.allclose(out, ref_full, atol=3e-2, rtol=3e-2), \
        "small-batch drift vs full-precision reference exceeds bf16 budget"

    # --- Batch-tiled path (small tile override to exercise it cheaply) ----
    B2 = 300
    x2 = jax.random.normal(kx2, (B2, D_IN), dtype=jnp.float32)
    x2_bf16 = x2.astype(jnp.bfloat16)
    out2 = descriptor_linear(x2_bf16, w_bf16, shift, batch_tile=128)
    jax.block_until_ready(out2)
    assert out2.shape == (B2, D_OUT)

    ref2_match = _reference_matched(x2_bf16, w_bf16, shift)
    assert jnp.allclose(out2, ref2_match, atol=1e-4, rtol=1e-4), \
        "tiled-batch mismatch vs matched (bf16) reference"

    print("KERNEL_OK")
</pallas_src>

<mosaic_0001>
module attributes {stable_mosaic.version = 11 : i64} {
  func.func @_descriptor_linear_kernel(%arg0: memref<8x200xbf16, #tpu.memory_space<vmem>>, %arg1: memref<200x32xbf16, #tpu.memory_space<vmem>>, %arg2: memref<1x32xf32, #tpu.memory_space<vmem>>, %arg3: memref<8x32xf32, #tpu.memory_space<vmem>>) attributes {dimension_semantics = [], scalar_prefetch = 0 : i64, scratch_operands = 0 : i64, tpu.core_type = #tpu.core_type<tc>} {
    %c0 = arith.constant 0 : index
    %c0_0 = arith.constant 0 : index
    %0 = vector.load %arg0[%c0, %c0_0] : memref<8x200xbf16, #tpu.memory_space<vmem>>, vector<8x200xbf16>
    %c0_1 = arith.constant 0 : index
    %c0_2 = arith.constant 0 : index
    %1 = vector.load %arg1[%c0_1, %c0_2] : memref<200x32xbf16, #tpu.memory_space<vmem>>, vector<200x32xbf16>
    %cst = arith.constant dense<0.000000e+00> : vector<8x32xf32>
    %2 = tpu.matmul %0, %1, %cst {dimension_numbers = #tpu.dot_dimension_numbers<[1], [0], [0], [1], [0, 0, 1, 1], [], []>} : vector<8x200xbf16>, vector<200x32xbf16>, vector<8x32xf32> -> vector<8x32xf32>
    %c0_3 = arith.constant 0 : index
    %c0_4 = arith.constant 0 : index
    %3 = vector.load %arg2[%c0_3, %c0_4] : memref<1x32xf32, #tpu.memory_space<vmem>>, vector<1x32xf32>
    %4 = vector.broadcast %3 : vector<1x32xf32> to vector<8x32xf32>
    %5 = arith.addf %2, %4 : vector<8x32xf32>
    %cst_5 = arith.constant 0.00999999977 : f32
    %6 = vector.broadcast %cst_5 : f32 to vector<8x32xf32>
    %7 = arith.mulf %6, %5 : vector<8x32xf32>
    %8 = arith.maximumf %5, %7 : vector<8x32xf32>
    %c0_6 = arith.constant 0 : index
    %c0_7 = arith.constant 0 : index
    %9 = vector.load %arg3[%c0_6, %c0_7] : memref<8x32xf32, #tpu.memory_space<vmem>>, vector<8x32xf32>
    tpu.vector_store %arg3[%c0_6, %c0_7], %8 {strides = array<i32>} : memref<8x32xf32, #tpu.memory_space<vmem>>, vector<8x32xf32>,
    return
  }
}

</mosaic_0001>

<bundles_post_ra>
// kernel: tpu_custom_call.1
= control target key start
LH: loop header
LB: loop body
LE: loop exit
PB: predicated region body
PF: predicated region fallthrough
CT: control target
= control target key end

     0   :  { %v254_v1 = vmov 0   ;;  %vm130_vm0 = vcmask 588800   ;;  %s333_s0 = inlined_call_operand.vmem [shape: bf16[8,200], index: 0, kind: input, shape index: {}]   ;;  %s334_s1 = inlined_call_operand.vmem [shape: bf16[200,32], index: 1, kind: input, shape index: {}]   ;;  %s335_s2 = inlined_call_operand.vmem [shape: f32[1,32], index: 2, kind: input, shape index: {}]   ;;  %s336_s3 = inlined_call_operand.hbm [shape: f32[8,32], index: 3, kind: output, shape index: {}]  }
   0x1   :  { %v215_v0 = vld [vmem:[%s334_s1] sm:$0xff]   ;;  %138 = vmatprep.subr.bf16.mxu0 %v254_v1  ;;  %v216_v2 = vld [vmem:[%s334_s1 + $0x8] sm:$0xff]   ;;  %v217_v3 = vld [vmem:[%s334_s1 + $0x10] sm:$0xff]  }
   0x2   :  { %139 = vmatpush1.bf16.msra.mxu0 %v215_v0  ;;  %v218_v4 = vld [vmem:[%s334_s1 + $0x18] sm:$0xff]   ;;  %v16_v5 = vld [vmem:[%s333_s0] sm:$0xff] }
   0x3   :  { %140 = vmatprep.subr.bf16.mxu0 %v254_v1  ;;  %v198_v6 = vcombine.high %v16_v5, %v16_v5 }
   0x6   :  { %141 = vmatpush1.bf16.msra.mxu0 %v216_v2 }
   0x7   :  { %142 = vmatprep.subr.bf16.mxu0 %v254_v1 }
   0xa   :  { %143 = vmatpush1.bf16.msra.mxu0 %v217_v3 }
   0xb   :  { %144 = vmatprep.subr.bf16.mxu0 %v254_v1 }
   0xc   :  { %8 = vsyncpa [#allocation3], 0  ;;  %v219_v7 = vld [vmem:[%s334_s1 + $0x20] sm:$0xff]   ;;  %212 = vmatprep.mubr.msk.bf16.mxu0 %vm130_vm0, %v198_v6  ;;  %v220_v8 = vld [vmem:[%s334_s1 + $0x28] sm:$0xff]   ;;  %vm134_vm1 = vcmask 1043456   ;;  %v197_v17 = vcombine.low %v16_v5, %v16_v5  ;;  %s255_s14 = smov [#allocation2]  }
   0xd   :  { %v221_v9 = vld [vmem:[%s334_s1 + $0x30] sm:$0xff]   ;;  %v222_v10 = vld [vmem:[%s334_s1 + $0x38] sm:$0xff]   ;;  %v223_v11 = vld [vmem:[%s334_s1 + $0x40] sm:$0xff]   ;;  %s188_s15 = sshll.u32 %s255_s14, 4  ;;  %vm180_vm2 = vcmask 261120   ;;  %s189_s15 = int_to_ptr.vmem [resolvable:$true] %s188_s15 }
   0xe   :  { %145 = vmatpush1.bf16.msra.mxu0 %v218_v4  ;;  %v224_v12 = vld [vmem:[%s334_s1 + $0x48] sm:$0xff]   ;;  %v225_v13 = vld [vmem:[%s334_s1 + $0x50] sm:$0xff]   ;;  %v226_v14 = vld [vmem:[%s334_s1 + $0x58] sm:$0xff]   ;;  %p235_p1 = scmp.lt.s32.totalorder %s189_s15, %s189_s15 }
   0xf   :  { %146 = vmatprep.subr.bf16.mxu0 %v254_v1  ;;  %v227_v15 = vld [vmem:[%s334_s1 + $0x60] ss:$0 sps:$4 sm:$0xff]   ;;  %s230_s1 = scalar_lea.vmem %s189_s15, 128 }
  0x10   :  { %v136_v16 = vsel %vm134_vm1, %v227_v15, 0  ;;  %v196_v18 = vld [vmem:[%s335_s2] ss:$0 sm:$0xff]  ;;  %p231_p0 = scmp.ne.s32.totalorder %s189_s15, %s230_s1  ;;  %p236_p2 = scmp.lt.s32.totalorder %s230_s1, %s230_s1 }
  0x12   :  { %147 = vmatpush1.bf16.msra.mxu0 %v219_v7  ;;  %p237_p3 = por %p236_p2, %p235_p1 }
  0x13   :  { %148 = vmatprep.subr.bf16.mxu0 %v254_v1 }
  0x14   :  { %p238_p4 = pnand %p237_p3, %p231_p0 }
  0x16   :  { %149 = vmatpush1.bf16.msra.mxu0 %v220_v8 }
  0x17   :  { %150 = vmatprep.subr.bf16.mxu0 %v254_v1 }
  0x1a   :  { %151 = vmatpush1.bf16.msra.mxu0 %v221_v9 }
  0x1b   :  { %152 = vmatprep.subr.bf16.mxu0 %v254_v1 }
  0x1e   :  { %153 = vmatpush1.bf16.msra.mxu0 %v222_v10 }
  0x1f   :  { %154 = vmatprep.subr.bf16.mxu0 %v254_v1 }
  0x22   :  { %155 = vmatpush1.bf16.msra.mxu0 %v223_v11 }
  0x23   :  { %156 = vmatprep.subr.bf16.mxu0 %v254_v1 }
  0x26   :  { %157 = vmatpush1.bf16.msra.mxu0 %v224_v12 }
  0x27   :  { %158 = vmatprep.subr.bf16.mxu0 %v254_v1 }
  0x2a   :  { %159 = vmatpush1.bf16.msra.mxu0 %v225_v13 }
  0x2b   :  { %160 = vmatprep.subr.bf16.mxu0 %v254_v1 }
  0x2e   :  { %161 = vmatpush1.bf16.msra.mxu0 %v226_v14 }
  0x2f   :  { %162 = vmatprep.subr.bf16.mxu0 %v254_v1 }
  0x32   :  { %163 = vmatpush1.bf16.msra.mxu0 %v136_v16 }
  0x35   :  { %171 = vmatmul.mubr.bf16.vlgmr.msra.gmra.mrb[0].mxu0 %v197_v17 }
 0x108   :  { %v172_v19 = vpop.f32.mrb[0].mxu0 }
 0x109   :  { %v173_v20 = vadd.f32 %v196_v18, %v172_v19  ;;  %v174_v21 = vpop.f32.mrb[1].mxu0 }
 0x10a   :  { %v175_v22 = vpop.f32.mrb[2].mxu0 }
 0x10b   :  { %v178_v23 = vmul.f32 0.01, %v173_v20  ;;  %v176_v24 = vpop.f32.mrb[3].mxu0 }
 0x10d   :  { %v179_v25 = vmax.f32 %v173_v20, %v178_v23 }
 0x10f   :  { %181 = vst.msk [vmem:[#allocation2] sm:$0xff] %vm180_vm2, %v179_v25 }
 0x110   :  { %241 = shalt.err (!%p238_p4)
}
 0x111   :  { %s242_s17 = scalar_lea.hbm %s336_s3, 128 }
 0x112   :  { %p243_p5 = scmp.ne.s32.totalorder %s336_s3, %s242_s17  ;;  %p246_p6 = scmp.lt.u32.totalorder %s242_s17, %s336_s3 }
 0x114   :  { %p248_p7 = pnand %p246_p6, %p243_p5 }
 0x116   :  { %251 = shalt.err (!%p248_p7)
}
 0x117   :  { %191 = dma.vmem_to_hbm [thread:$0]  %s189_s15, 128, %s336_s3, [#allocation3]  }
 0x118   :  { %252 = dma.done.wait [#allocation3], 128  }
 0x119   :  { %253 = vsyncadd [#allocation3], 4294967168 }
 0x11a   :  { %195 = vsyncpa [#allocation3], 1 }

</bundles_post_ra>
